<compile_context>
chip_gen: v6e
topology: v6e:2x2x1
jax: 0.10.0
libtpu: 0.0.40
codegen_flags: <defaults>
</compile_context>

<pallas_src>
import jax
import jax.numpy as jnp
from jax.experimental import pallas as pl
from jax.experimental.pallas import tpu as pltpu

BN_EPS = 1e-5


def _round_up(v, m):
    return (v + m - 1) // m * m


def _make_kernel(n_true):
    """Kernel factory; the true (unpadded) batch size is a trace-time constant."""
    inv_n = 1.0 / float(n_true)

    def kernel(mask_ref, x_ref, w1_ref, w2_ref, g2_ref, be2_ref,
               w3_ref, g3_ref, be3_ref, b3_ref, o_ref):
        row_mask = mask_ref[...]                       # (N_pad, 1) f32: 1 for real rows
        x = x_ref[...]                                 # (N_pad, K) bf16

        # ---- conv1_sub: 32x32 "whole image" conv == one MXU matmul.
        # conv1's bias is omitted (cancelled by conv2_sub's BN mean subtraction).
        h1 = jnp.dot(x, w1_ref[...],
                     preferred_element_type=jnp.float32)       # (N_pad, H_pad) f32

        # ---- conv2_sub: BN (training-mode batch stats) -> relu -> 1x1 conv.
        # Padded rows of h1 are exactly zero, so one-pass sums over the padded
        # batch divided by the true N give exact statistics.
        s1 = jnp.sum(h1, axis=0, keepdims=True)
        q1 = jnp.sum(h1 * h1, axis=0, keepdims=True)
        mu1 = s1 * inv_n
        var1 = q1 * inv_n - mu1 * mu1
        h1n = (h1 - mu1) * jax.lax.rsqrt(var1 + BN_EPS)
        h1n = h1n * g2_ref[...] + be2_ref[...]
        h1n = h1n * row_mask        # re-zero padded rows -> next BN sums stay exact
        a1 = jnp.maximum(h1n, 0.0).astype(jnp.bfloat16)
        h2 = jnp.dot(a1, w2_ref[...],
                     preferred_element_type=jnp.float32)       # (N_pad, H_pad) f32

        # ---- conv3_sub: BN -> relu -> 1x1 conv (+ final bias, NOT BN-cancelled).
        s2 = jnp.sum(h2, axis=0, keepdims=True)
        q2 = jnp.sum(h2 * h2, axis=0, keepdims=True)
        mu2 = s2 * inv_n
        var2 = q2 * inv_n - mu2 * mu2
        h2n = (h2 - mu2) * jax.lax.rsqrt(var2 + BN_EPS)
        h2n = h2n * g3_ref[...] + be3_ref[...]
        h2n = h2n * row_mask
        a2 = jnp.maximum(h2n, 0.0).astype(jnp.bfloat16)
        y = jnp.dot(a2, w3_ref[...],
                    preferred_element_type=jnp.float32)        # (N_pad, C_pad) f32
        o_ref[...] = y + b3_ref[...]

    return kernel


def hiddenlayer2fc_forward(x_nchw, params):
    """HiddenLayer_2_FC forward.  x_nchw: (N, 3, 32, 32) f32 -> (N, numClass) f32."""
    N, CIN, S, _ = x_nchw.shape
    w1_conv = params["w1"]            # (H, 3, 32, 32)
    w2_conv = params["w2"]            # (H, H, 1, 1)
    w3_conv = params["w3"]            # (C, H, 1, 1)
    b3 = params["b3"]                 # (C,)
    H = w1_conv.shape[0]
    C = w3_conv.shape[0]
    K = CIN * S * S

    # xnorm='' (default): the external misc.* normalization branch is not implemented.

    # Lane/sublane-dense padded sizes.
    N_pad = _round_up(max(N, 8), 8)
    H_pad = _round_up(H, 128)
    C_pad = _round_up(C, 128)

    def pad2(a, r, c):
        return jnp.pad(a, ((0, r - a.shape[0]), (0, c - a.shape[1])))

    # JAX glue: flatten conv weights to matmul form, zero-pad, cast matmul
    # operands to bf16.  BN gamma/beta and the final bias stay f32.
    x_flat = pad2(x_nchw.reshape(N, K), N_pad, K).astype(jnp.bfloat16)
    w1 = pad2(w1_conv.reshape(H, K).T, K, H_pad).astype(jnp.bfloat16)
    w2 = pad2(w2_conv.reshape(H, H).T, H_pad, H_pad).astype(jnp.bfloat16)
    w3 = pad2(w3_conv.reshape(C, H).T, H_pad, C_pad).astype(jnp.bfloat16)
    g2 = pad2(params["gamma2"].reshape(1, H), 1, H_pad)
    be2 = pad2(params["beta2"].reshape(1, H), 1, H_pad)
    g3 = pad2(params["gamma3"].reshape(1, H), 1, H_pad)
    be3 = pad2(params["beta3"].reshape(1, H), 1, H_pad)
    b3p = pad2(b3.reshape(1, C), 1, C_pad)
    row_mask = (jnp.arange(N_pad) < N).astype(jnp.float32).reshape(N_pad, 1)

    full = lambda shape: pl.BlockSpec(shape, lambda i: (0,) * len(shape))

    out = pl.pallas_call(
        _make_kernel(N),
        out_shape=jax.ShapeDtypeStruct((N_pad, C_pad), jnp.float32),
        grid=(1,),
        in_specs=[
            full((N_pad, 1)),         # row mask
            full((N_pad, K)),         # x (bf16)
            full((K, H_pad)),         # w1 (bf16)
            full((H_pad, H_pad)),     # w2 (bf16)
            full((1, H_pad)),         # gamma2
            full((1, H_pad)),         # beta2
            full((H_pad, C_pad)),     # w3 (bf16)
            full((1, H_pad)),         # gamma3
            full((1, H_pad)),         # beta3
            full((1, C_pad)),         # conv3 bias
        ],
        out_specs=full((N_pad, C_pad)),
        compiler_params=pltpu.CompilerParams(
            dimension_semantics=("arbitrary",)),
    )(row_mask, x_flat, w1, w2, g2, be2, w3, g3, be3, b3p)

    return out[:N, :C]


def make_params(key, hidden_size, num_class, cin=3, ksize=32):
    """Synthetic params matching HiddenLayer_2_FC after init_convnet (const_norm, scale=1)."""
    ks = jax.random.split(key, 4)

    def const_norm(k, shape):
        w = 0.05 * jax.random.normal(k, shape, jnp.float32)
        return w / jnp.linalg.norm(w.reshape(-1))

    w1 = const_norm(ks[0], (hidden_size, cin, ksize, ksize))      # conv1_sub.conv
    w2 = const_norm(ks[1], (hidden_size, hidden_size, 1, 1))      # conv2_sub.conv
    w3 = const_norm(ks[2], (num_class, hidden_size, 1, 1))        # conv3_sub.conv
    b3 = 0.05 * jax.random.normal(ks[3], (num_class,), jnp.float32)
    # conv1/conv2 biases are mathematically cancelled by the following BN's
    # mean subtraction, so they are not generated / used at all.
    return {
        "w1": w1, "w2": w2, "w3": w3, "b3": b3,
        "gamma2": jnp.ones((hidden_size,), jnp.float32),
        "beta2": jnp.zeros((hidden_size,), jnp.float32),
        "gamma3": jnp.ones((hidden_size,), jnp.float32),
        "beta3": jnp.zeros((hidden_size,), jnp.float32),
    }


def hiddenlayer2fc_reference(x_nchw, params):
    """Pure-JAX reference with the same bf16 matmul casts / one-pass BN stats."""
    N = x_nchw.shape[0]
    H = params["w1"].shape[0]
    C = params["w3"].shape[0]
    x = x_nchw.reshape(N, -1).astype(jnp.bfloat16)
    w1 = params["w1"].reshape(H, -1).T.astype(jnp.bfloat16)
    w2 = params["w2"].reshape(H, H).T.astype(jnp.bfloat16)
    w3 = params["w3"].reshape(C, H).T.astype(jnp.bfloat16)

    def bn(h, g, b):
        mu = jnp.mean(h, axis=0, keepdims=True)
        var = jnp.mean(h * h, axis=0, keepdims=True) - mu * mu
        return (h - mu) * jax.lax.rsqrt(var + BN_EPS) * g + b

    h1 = jnp.dot(x, w1, preferred_element_type=jnp.float32)
    a1 = jnp.maximum(bn(h1, params["gamma2"], params["beta2"]), 0.0).astype(jnp.bfloat16)
    h2 = jnp.dot(a1, w2, preferred_element_type=jnp.float32)
    a2 = jnp.maximum(bn(h2, params["gamma3"], params["beta3"]), 0.0).astype(jnp.bfloat16)
    return jnp.dot(a2, w3, preferred_element_type=jnp.float32) + params["b3"]


if __name__ == "__main__":
    # kernel size 32 forces 32x32 spatial input (CIFAR-style), 3 input channels.
    N, CIN, S = 2, 3, 32
    HIDDEN, NUM_CLASS = 32, 10

    key = jax.random.PRNGKey(0)
    kx, kp = jax.random.split(key)
    x = jax.random.normal(kx, (N, CIN, S, S), jnp.float32)
    params = make_params(kp, HIDDEN, NUM_CLASS)

    out = jax.block_until_ready(hiddenlayer2fc_forward(x, params))
    ref = hiddenlayer2fc_reference(x, params)

    assert out.shape == (N, NUM_CLASS)
    err = float(jnp.max(jnp.abs(out - ref)))
    # Tolerance accounts for bf16 matmul operands + training-mode BN at N=2
    # (near-zero batch variance amplifies tiny rounding/ordering differences);
    # a genuinely wrong kernel errs at O(0.1) or more here.
    assert err < 2e-2, f"mismatch vs reference: {err}"

    print("KERNEL_OK")
</pallas_src>

<mosaic_0001>
module attributes {stable_mosaic.version = 11 : i64} {
  func.func @kernel(%arg0: i32, %arg1: memref<8x1xf32, #tpu.memory_space<vmem>>, %arg2: memref<8x3072xbf16, #tpu.memory_space<vmem>>, %arg3: memref<3072x128xbf16, #tpu.memory_space<vmem>>, %arg4: memref<128x128xbf16, #tpu.memory_space<vmem>>, %arg5: memref<1x128xf32, #tpu.memory_space<vmem>>, %arg6: memref<1x128xf32, #tpu.memory_space<vmem>>, %arg7: memref<128x128xbf16, #tpu.memory_space<vmem>>, %arg8: memref<1x128xf32, #tpu.memory_space<vmem>>, %arg9: memref<1x128xf32, #tpu.memory_space<vmem>>, %arg10: memref<1x128xf32, #tpu.memory_space<vmem>>, %arg11: memref<8x128xf32, #tpu.memory_space<vmem>>) attributes {dimension_semantics = [#tpu.dimension_semantics<arbitrary>], iteration_bounds = array<i64: 1>, scalar_prefetch = 0 : i64, scratch_operands = 0 : i64, tpu.core_type = #tpu.core_type<tc>, window_params = [{pipeline_mode = #tpu.pipeline_mode<synchronous>, transform_indices = @transform_0, window_bounds = array<i64: 8, 1>}, {pipeline_mode = #tpu.pipeline_mode<synchronous>, transform_indices = @transform_1, window_bounds = array<i64: 8, 3072>}, {pipeline_mode = #tpu.pipeline_mode<synchronous>, transform_indices = @transform_2, window_bounds = array<i64: 3072, 128>}, {pipeline_mode = #tpu.pipeline_mode<synchronous>, transform_indices = @transform_3, window_bounds = array<i64: 128, 128>}, {pipeline_mode = #tpu.pipeline_mode<synchronous>, transform_indices = @transform_4, window_bounds = array<i64: 1, 128>}, {pipeline_mode = #tpu.pipeline_mode<synchronous>, transform_indices = @transform_5, window_bounds = array<i64: 1, 128>}, {pipeline_mode = #tpu.pipeline_mode<synchronous>, transform_indices = @transform_6, window_bounds = array<i64: 128, 128>}, {pipeline_mode = #tpu.pipeline_mode<synchronous>, transform_indices = @transform_7, window_bounds = array<i64: 1, 128>}, {pipeline_mode = #tpu.pipeline_mode<synchronous>, transform_indices = @transform_8, window_bounds = array<i64: 1, 128>}, {pipeline_mode = #tpu.pipeline_mode<synchronous>, transform_indices = @transform_9, window_bounds = array<i64: 1, 128>}, {pipeline_mode = #tpu.pipeline_mode<synchronous>, transform_indices = @transform_10, window_bounds = array<i64: 8, 128>}]} {
    %c0 = arith.constant 0 : index
    %c0_0 = arith.constant 0 : index
    %0 = vector.load %arg1[%c0, %c0_0] : memref<8x1xf32, #tpu.memory_space<vmem>>, vector<8x1xf32>
    %c0_1 = arith.constant 0 : index
    %c0_2 = arith.constant 0 : index
    %1 = vector.load %arg2[%c0_1, %c0_2] : memref<8x3072xbf16, #tpu.memory_space<vmem>>, vector<8x3072xbf16>
    %c0_3 = arith.constant 0 : index
    %c0_4 = arith.constant 0 : index
    %2 = vector.load %arg3[%c0_3, %c0_4] : memref<3072x128xbf16, #tpu.memory_space<vmem>>, vector<3072x128xbf16>
    %cst = arith.constant dense<0.000000e+00> : vector<8x128xf32>
    %3 = tpu.matmul %1, %2, %cst {dimension_numbers = #tpu.dot_dimension_numbers<[1], [0], [0], [1], [0, 0, 1, 1], [], []>} : vector<8x3072xbf16>, vector<3072x128xbf16>, vector<8x128xf32> -> vector<8x128xf32>
    %cst_5 = arith.constant dense<0.000000e+00> : vector<128xf32>
    %4 = vector.multi_reduction <add>, %3, %cst_5 [0] : vector<8x128xf32> to vector<128xf32>
    %5 = vector.shape_cast %4 : vector<128xf32> to vector<1x128xf32>
    %6 = arith.mulf %3, %3 : vector<8x128xf32>
    %cst_6 = arith.constant dense<0.000000e+00> : vector<128xf32>
    %7 = vector.multi_reduction <add>, %6, %cst_6 [0] : vector<8x128xf32> to vector<128xf32>
    %8 = vector.shape_cast %7 : vector<128xf32> to vector<1x128xf32>
    %cst_7 = arith.constant 5.000000e-01 : f32
    %9 = vector.broadcast %cst_7 : f32 to vector<1x128xf32>
    %10 = arith.mulf %5, %9 : vector<1x128xf32>
    %cst_8 = arith.constant 5.000000e-01 : f32
    %11 = vector.broadcast %cst_8 : f32 to vector<1x128xf32>
    %12 = arith.mulf %8, %11 : vector<1x128xf32>
    %13 = arith.mulf %10, %10 : vector<1x128xf32>
    %14 = arith.subf %12, %13 : vector<1x128xf32>
    %15 = vector.broadcast %10 : vector<1x128xf32> to vector<8x128xf32>
    %16 = arith.subf %3, %15 : vector<8x128xf32>
    %cst_9 = arith.constant 9.99999974E-6 : f32
    %17 = vector.broadcast %cst_9 : f32 to vector<1x128xf32>
    %18 = arith.addf %14, %17 : vector<1x128xf32>
    %19 = math.rsqrt %18 : vector<1x128xf32>
    %20 = vector.broadcast %19 : vector<1x128xf32> to vector<8x128xf32>
    %21 = arith.mulf %16, %20 : vector<8x128xf32>
    %c0_10 = arith.constant 0 : index
    %c0_11 = arith.constant 0 : index
    %22 = vector.load %arg5[%c0_10, %c0_11] : memref<1x128xf32, #tpu.memory_space<vmem>>, vector<1x128xf32>
    %23 = vector.broadcast %22 : vector<1x128xf32> to vector<8x128xf32>
    %24 = arith.mulf %21, %23 : vector<8x128xf32>
    %c0_12 = arith.constant 0 : index
    %c0_13 = arith.constant 0 : index
    %25 = vector.load %arg6[%c0_12, %c0_13] : memref<1x128xf32, #tpu.memory_space<vmem>>, vector<1x128xf32>
    %26 = vector.broadcast %25 : vector<1x128xf32> to vector<8x128xf32>
    %27 = arith.addf %24, %26 : vector<8x128xf32>
    %28 = vector.broadcast %0 : vector<8x1xf32> to vector<8x128xf32>
    %29 = arith.mulf %27, %28 : vector<8x128xf32>
    %cst_14 = arith.constant 0.000000e+00 : f32
    %30 = vector.broadcast %cst_14 : f32 to vector<8x128xf32>
    %31 = arith.maximumf %29, %30 : vector<8x128xf32>
    %32 = arith.truncf %31 : vector<8x128xf32> to vector<8x128xbf16>
    %c0_15 = arith.constant 0 : index
    %c0_16 = arith.constant 0 : index
    %33 = vector.load %arg4[%c0_15, %c0_16] : memref<128x128xbf16, #tpu.memory_space<vmem>>, vector<128x128xbf16>
    %cst_17 = arith.constant dense<0.000000e+00> : vector<8x128xf32>
    %34 = tpu.matmul %32, %33, %cst_17 {dimension_numbers = #tpu.dot_dimension_numbers<[1], [0], [0], [1], [0, 0, 1, 1], [], []>} : vector<8x128xbf16>, vector<128x128xbf16>, vector<8x128xf32> -> vector<8x128xf32>
    %cst_18 = arith.constant dense<0.000000e+00> : vector<128xf32>
    %35 = vector.multi_reduction <add>, %34, %cst_18 [0] : vector<8x128xf32> to vector<128xf32>
    %36 = vector.shape_cast %35 : vector<128xf32> to vector<1x128xf32>
    %37 = arith.mulf %34, %34 : vector<8x128xf32>
    %cst_19 = arith.constant dense<0.000000e+00> : vector<128xf32>
    %38 = vector.multi_reduction <add>, %37, %cst_19 [0] : vector<8x128xf32> to vector<128xf32>
    %39 = vector.shape_cast %38 : vector<128xf32> to vector<1x128xf32>
    %cst_20 = arith.constant 5.000000e-01 : f32
    %40 = vector.broadcast %cst_20 : f32 to vector<1x128xf32>
    %41 = arith.mulf %36, %40 : vector<1x128xf32>
    %cst_21 = arith.constant 5.000000e-01 : f32
    %42 = vector.broadcast %cst_21 : f32 to vector<1x128xf32>
    %43 = arith.mulf %39, %42 : vector<1x128xf32>
    %44 = arith.mulf %41, %41 : vector<1x128xf32>
    %45 = arith.subf %43, %44 : vector<1x128xf32>
    %46 = vector.broadcast %41 : vector<1x128xf32> to vector<8x128xf32>
    %47 = arith.subf %34, %46 : vector<8x128xf32>
    %cst_22 = arith.constant 9.99999974E-6 : f32
    %48 = vector.broadcast %cst_22 : f32 to vector<1x128xf32>
    %49 = arith.addf %45, %48 : vector<1x128xf32>
    %50 = math.rsqrt %49 : vector<1x128xf32>
    %51 = vector.broadcast %50 : vector<1x128xf32> to vector<8x128xf32>
    %52 = arith.mulf %47, %51 : vector<8x128xf32>
    %c0_23 = arith.constant 0 : index
    %c0_24 = arith.constant 0 : index
    %53 = vector.load %arg8[%c0_23, %c0_24] : memref<1x128xf32, #tpu.memory_space<vmem>>, vector<1x128xf32>
    %54 = vector.broadcast %53 : vector<1x128xf32> to vector<8x128xf32>
    %55 = arith.mulf %52, %54 : vector<8x128xf32>
    %c0_25 = arith.constant 0 : index
    %c0_26 = arith.constant 0 : index
    %56 = vector.load %arg9[%c0_25, %c0_26] : memref<1x128xf32, #tpu.memory_space<vmem>>, vector<1x128xf32>
    %57 = vector.broadcast %56 : vector<1x128xf32> to vector<8x128xf32>
    %58 = arith.addf %55, %57 : vector<8x128xf32>
    %59 = vector.broadcast %0 : vector<8x1xf32> to vector<8x128xf32>
    %60 = arith.mulf %58, %59 : vector<8x128xf32>
    %cst_27 = arith.constant 0.000000e+00 : f32
    %61 = vector.broadcast %cst_27 : f32 to vector<8x128xf32>
    %62 = arith.maximumf %60, %61 : vector<8x128xf32>
    %63 = arith.truncf %62 : vector<8x128xf32> to vector<8x128xbf16>
    %c0_28 = arith.constant 0 : index
    %c0_29 = arith.constant 0 : index
    %64 = vector.load %arg7[%c0_28, %c0_29] : memref<128x128xbf16, #tpu.memory_space<vmem>>, vector<128x128xbf16>
    %cst_30 = arith.constant dense<0.000000e+00> : vector<8x128xf32>
    %65 = tpu.matmul %63, %64, %cst_30 {dimension_numbers = #tpu.dot_dimension_numbers<[1], [0], [0], [1], [0, 0, 1, 1], [], []>} : vector<8x128xbf16>, vector<128x128xbf16>, vector<8x128xf32> -> vector<8x128xf32>
    %c0_31 = arith.constant 0 : index
    %c0_32 = arith.constant 0 : index
    %66 = vector.load %arg10[%c0_31, %c0_32] : memref<1x128xf32, #tpu.memory_space<vmem>>, vector<1x128xf32>
    %67 = vector.broadcast %66 : vector<1x128xf32> to vector<8x128xf32>
    %68 = arith.addf %65, %67 : vector<8x128xf32>
    %c0_33 = arith.constant 0 : index
    %c0_34 = arith.constant 0 : index
    %69 = vector.load %arg11[%c0_33, %c0_34] : memref<8x128xf32, #tpu.memory_space<vmem>>, vector<8x128xf32>
    tpu.vector_store %arg11[%c0_33, %c0_34], %68 {strides = array<i32>} : memref<8x128xf32, #tpu.memory_space<vmem>>, vector<8x128xf32>,
    return
  }
  func.func @transform_0(%arg0: i32) -> (i32, i32) {
    %c0_i32 = arith.constant 0 : i32
    %c0_i32_0 = arith.constant 0 : i32
    %c0_i32_1 = arith.constant 0 : i32
    return %c0_i32, %c0_i32_0 : i32, i32
  }
  func.func @transform_1(%arg0: i32) -> (i32, i32) {
    %c0_i32 = arith.constant 0 : i32
    %c0_i32_0 = arith.constant 0 : i32
    %c0_i32_1 = arith.constant 0 : i32
    return %c0_i32, %c0_i32_0 : i32, i32
  }
  func.func @transform_2(%arg0: i32) -> (i32, i32) {
    %c0_i32 = arith.constant 0 : i32
    %c0_i32_0 = arith.constant 0 : i32
    %c0_i32_1 = arith.constant 0 : i32
    return %c0_i32, %c0_i32_0 : i32, i32
  }
  func.func @transform_3(%arg0: i32) -> (i32, i32) {
    %c0_i32 = arith.constant 0 : i32
    %c0_i32_0 = arith.constant 0 : i32
    %c0_i32_1 = arith.constant 0 : i32
    return %c0_i32, %c0_i32_0 : i32, i32
  }
  func.func @transform_4(%arg0: i32) -> (i32, i32) {
    %c0_i32 = arith.constant 0 : i32
    %c0_i32_0 = arith.constant 0 : i32
    %c0_i32_1 = arith.constant 0 : i32
    return %c0_i32, %c0_i32_0 : i32, i32
  }
  func.func @transform_5(%arg0: i32) -> (i32, i32) {
    %c0_i32 = arith.constant 0 : i32
    %c0_i32_0 = arith.constant 0 : i32
    %c0_i32_1 = arith.constant 0 : i32
    return %c0_i32, %c0_i32_0 : i32, i32
  }
  func.func @transform_6(%arg0: i32) -> (i32, i32) {
    %c0_i32 = arith.constant 0 : i32
    %c0_i32_0 = arith.constant 0 : i32
    %c0_i32_1 = arith.constant 0 : i32
    return %c0_i32, %c0_i32_0 : i32, i32
  }
  func.func @transform_7(%arg0: i32) -> (i32, i32) {
    %c0_i32 = arith.constant 0 : i32
    %c0_i32_0 = arith.constant 0 : i32
    %c0_i32_1 = arith.constant 0 : i32
    return %c0_i32, %c0_i32_0 : i32, i32
  }
  func.func @transform_8(%arg0: i32) -> (i32, i32) {
    %c0_i32 = arith.constant 0 : i32
    %c0_i32_0 = arith.constant 0 : i32
    %c0_i32_1 = arith.constant 0 : i32
    return %c0_i32, %c0_i32_0 : i32, i32
  }
  func.func @transform_9(%arg0: i32) -> (i32, i32) {
    %c0_i32 = arith.constant 0 : i32
    %c0_i32_0 = arith.constant 0 : i32
    %c0_i32_1 = arith.constant 0 : i32
    return %c0_i32, %c0_i32_0 : i32, i32
  }
  func.func @transform_10(%arg0: i32) -> (i32, i32) {
    %c0_i32 = arith.constant 0 : i32
    %c0_i32_0 = arith.constant 0 : i32
    %c0_i32_1 = arith.constant 0 : i32
    return %c0_i32, %c0_i32_0 : i32, i32
  }
}

</mosaic_0001>

<bundles_post_ra>
// kernel: tpu_custom_call.1
= control target key start
LH: loop header
LB: loop body
LE: loop exit
PB: predicated region body
PF: predicated region fallthrough
CT: control target
= control target key end

     0   :  { %15 = vsyncpa [#allocation3], 0  ;;  %s3560_s0 = inlined_call_operand.vmem [shape: f32[8,1], index: 0, kind: input, shape index: {}]   ;;  %s3561_s1 = inlined_call_operand.hbm [shape: bf16[8,3072], index: 1, kind: input, shape index: {}]   ;;  %s3562_s2 = inlined_call_operand.hbm [shape: bf16[3072,128], index: 2, kind: input, shape index: {}]   ;;  %s3563_s3 = inlined_call_operand.hbm [shape: bf16[128,128], index: 3, kind: input, shape index: {}]   ;;  %s3564_s4 = inlined_call_operand.vmem [shape: f32[1,128], index: 4, kind: input, shape index: {}]   ;;  %s3565_s5 = inlined_call_operand.vmem [shape: f32[1,128], index: 5, kind: input, shape index: {}]   ;;  %s3566_s6 = inlined_call_operand.hbm [shape: bf16[128,128], index: 6, kind: input, shape index: {}]   ;;  %s3567_s7 = inlined_call_operand.vmem [shape: f32[1,128], index: 7, kind: input, shape index: {}]   ;;  %s3568_s8 = inlined_call_operand.vmem [shape: f32[1,128], index: 8, kind: input, shape index: {}]   ;;  %s3569_s9 = inlined_call_operand.vmem [shape: f32[1,128], index: 9, kind: input, shape index: {}]   ;;  %s3570_s10 = inlined_call_operand.hbm [shape: f32[8,128], index: 10, kind: output, shape index: {}]  }
   0x1   :  { %16 = vsyncpa [#allocation6], 0 }
   0x2   :  { %17 = vsyncpa [#allocation9], 0 }
   0x3   :  { %18 = vsyncpa [#allocation4], 0  ;;  %s3435_s13 = smov [#allocation5]  }
   0x4   :  { %s36_s14 = sshll.u32 %s3435_s13, 4  ;;  %s37_s14 = int_to_ptr.vmem [resolvable:$true] %s36_s14 }
   0x5   :  { %s3335_s15 = scalar_lea.vmem %s37_s14, 24576  ;;  %p3340_p1 = scmp.lt.s32.totalorder %s37_s14, %s37_s14 }
   0x6   :  { %p3336_p0 = scmp.ne.s32.totalorder %s37_s14, %s3335_s15  ;;  %p3341_p2 = scmp.lt.s32.totalorder %s3335_s15, %s3335_s15 }
   0x8   :  { %p3342_p3 = por %p3341_p2, %p3340_p1 }
   0xa   :  { %p3343_p4 = pnand %p3342_p3, %p3336_p0 }
   0xc   :  { %3346 = shalt.err (!%p3343_p4)
}
   0xd   :  { %s3436_s16 = smov 64   ;;  %s3437_s17 = smov 4  }
   0xe   :  { %42 = dma.hbm_to_vmem [thread:$0]  %s3562_s2, 24576, %s37_s14, [#allocation6], %s3436_s16, %s3436_s16, %s3437_s17  }
   0xf   :  { %s3438_s20 = smov [#allocation2]   ;;  %s3439_s22 = smov [#allocation7]  }
  0x10   :  { %s27_s21 = sshll.u32 %s3438_s20, 4  ;;  %s48_s23 = sshll.u32 %s3439_s22, 4  ;;  %s28_s21 = int_to_ptr.vmem [resolvable:$true] %s27_s21  ;;  %s49_s23 = int_to_ptr.vmem [resolvable:$true] %s48_s23 }
  0x11   :  { %s3355_s24 = scalar_lea.vmem %s28_s21, 1536  ;;  %p3360_p6 = scmp.lt.s32.totalorder %s28_s21, %s28_s21 }
  0x12   :  { %p3356_p5 = scmp.ne.s32.totalorder %s28_s21, %s3355_s24  ;;  %p3361_p7 = scmp.lt.s32.totalorder %s3355_s24, %s3355_s24 }
  0x14   :  { %p3362_p8 = por %p3361_p7, %p3360_p6 }
  0x16   :  { %p3363_p9 = pnand %p3362_p8, %p3356_p5 }
  0x18   :  { %3366 = shalt.err (!%p3363_p9)
}
  0x19   :  { %30 = dma.hbm_to_vmem [thread:$0]  %s3561_s1, 1536, %s28_s21, [#allocation3]  }
  0x1a   :  { %s3375_s27 = scalar_lea.vmem %s49_s23, 1024  ;;  %p3380_p11 = scmp.lt.s32.totalorder %s49_s23, %s49_s23 }
  0x1b   :  { %p3376_p10 = scmp.ne.s32.totalorder %s49_s23, %s3375_s27  ;;  %p3381_p12 = scmp.lt.s32.totalorder %s3375_s27, %s3375_s27 }
  0x1d   :  { %p3382_p13 = por %p3381_p12, %p3380_p11 }
  0x1f   :  { %p3383_p0 = pnand %p3382_p13, %p3376_p10 }
  0x21   :  { %3386 = shalt.err (!%p3383_p0)
}
  0x22   :  { %54 = dma.hbm_to_vmem [thread:$0]  %s3563_s3, 1024, %s49_s23, [#allocation6], %s3436_s16, %s3436_s16, %s3437_s17  }
  0x23   :  { %s3440_s29 = smov [#allocation8]  }
  0x24   :  { %s64_s30 = sshll.u32 %s3440_s29, 4  ;;  %s65_s30 = int_to_ptr.vmem [resolvable:$true] %s64_s30 }
  0x25   :  { %s3395_s11 = scalar_lea.vmem %s65_s30, 1024  ;;  %p3400_p2 = scmp.lt.s32.totalorder %s65_s30, %s65_s30 }
  0x26   :  { %p3396_p1 = scmp.ne.s32.totalorder %s65_s30, %s3395_s11  ;;  %p3401_p3 = scmp.lt.s32.totalorder %s3395_s11, %s3395_s11 }
  0x28   :  { %p3402_p4 = por %p3401_p3, %p3400_p2 }
  0x2a   :  { %p3403_p5 = pnand %p3402_p4, %p3396_p1 }
  0x2c   :  { %3406 = shalt.err (!%p3403_p5)
}
  0x2d   :  { %70 = dma.hbm_to_vmem [thread:$0]  %s3566_s6, 1024, %s65_s30, [#allocation9], %s3436_s16, %s3436_s16, %s3437_s17  }
  0x2e   :  { %3427 = dma.done.wait [#allocation3], 1536  }
  0x2f   :  { %3428 = vsyncadd [#allocation3], 4294965760 }
  0x30   :  { %3429 = dma.done.wait [#allocation6], 25600  }
  0x31   :  { %3430 = vsyncadd [#allocation6], 4294941696 }
  0x32   :  { %3431 = dma.done.wait [#allocation9], 1024  }
  0x33   :  { %3432 = vsyncadd [#allocation9], 4294966272  ;;  %v3091_v0 = vld [vmem:[#allocation5 + $0x78] sm:$0xff]   ;;  %v3095_v4 = vld [vmem:[#allocation5 + $0x70] sm:$0xff]   ;;  %vm3443_vm0 = vmmov 0   ;;  %s3444_s20 = smov [#allocation10]  }
  0x34   :  { %v3092_v1 = vld [vmem:[#allocation5 + $0xf8] sm:$0xff]   ;;  %2758 = vmatprep.subr.bf16.mxu0 %v3091_v0  ;;  %v3096_v5 = vld [vmem:[#allocation5 + $0xf0] sm:$0xff]   ;;  %v3099_v8 = vld [vmem:[#allocation5 + $0x68] sm:$0xff]   ;;  %s2510_s21 = sshll.u32 %s3444_s20, 4  ;;  %s2511_s21 = int_to_ptr.vmem [resolvable:$true] %s2510_s21 }
  0x35   :  { %v3093_v2 = vld [vmem:[#allocation5 + $0x38] sm:$0xff]   ;;  %2780 = vmatprep.subr.bf16.mxu1 %v3092_v1  ;;  %v3097_v6 = vld [vmem:[#allocation5 + $0x30] sm:$0xff]   ;;  %v3100_v9 = vld [vmem:[#allocation5 + $0xe8] sm:$0xff]   ;;  %p3412_p7 = scmp.lt.s32.totalorder %s2511_s21, %s2511_s21 }
  0x36   :  { %v3094_v3 = vld [vmem:[#allocation5 + $0xb8] sm:$0xff]   ;;  %2759 = vmatpush3.bf16.msra.mxu0 %v3093_v2  ;;  %v3098_v7 = vld [vmem:[#allocation5 + $0xb0] sm:$0xff]   ;;  %v3101_v10 = vld [vmem:[#allocation5 + $0x28] sm:$0xff]  }
  0x37   :  { %2781 = vmatpush3.bf16.msra.mxu1 %v3094_v3  ;;  %2760 = vmatprep.subr.bf16.mxu0 %v3095_v4  ;;  %v3102_v11 = vld [vmem:[#allocation5 + $0xa8] sm:$0xff]   ;;  %v3103_v12 = vld [vmem:[#allocation5 + $0x60] sm:$0xff]   ;;  %v3107_v16 = vld [vmem:[#allocation5 + $0x58] sm:$0xff]  }
  0x38   :  { %2782 = vmatprep.subr.bf16.mxu1 %v3096_v5  ;;  %v3104_v13 = vld [vmem:[#allocation5 + $0xe0] sm:$0xff]   ;;  %v3108_v17 = vld [vmem:[#allocation5 + $0xd8] sm:$0xff]   ;;  %v3111_v20 = vld [vmem:[#allocation5 + $0x50] sm:$0xff]  }
  0x39   :  { %v3105_v14 = vld [vmem:[#allocation5 + $0x20] sm:$0xff]   ;;  %v3109_v18 = vld [vmem:[#allocation5 + $0x18] sm:$0xff]   ;;  %v3112_v21 = vld [vmem:[#allocation5 + $0xd0] sm:$0xff]  }
  0x3a   :  { %2761 = vmatpush3.bf16.msra.mxu0 %v3097_v6  ;;  %v3106_v15 = vld [vmem:[#allocation5 + $0xa0] sm:$0xff]   ;;  %v3110_v19 = vld [vmem:[#allocation5 + $0x98] sm:$0xff]   ;;  %v3113_v22 = vld [vmem:[#allocation5 + $0x10] sm:$0xff]  }
  0x3b   :  { %2783 = vmatpush3.bf16.msra.mxu1 %v3098_v7  ;;  %2762 = vmatprep.subr.bf16.mxu0 %v3099_v8  ;;  %v3114_v23 = vld [vmem:[#allocation5 + $0x90] sm:$0xff]   ;;  %v3115_v24 = vld [vmem:[#allocation5 + $0x48] sm:$0xff]   ;;  %v3119_v28 = vld [vmem:[#allocation5 + $0x40] sm:$0xff]  }
  0x3c   :  { %2784 = vmatprep.subr.bf16.mxu1 %v3100_v9  ;;  %v3116_v25 = vld [vmem:[#allocation5 + $0xc8] sm:$0xff]   ;;  %v3120_v29 = vld [vmem:[#allocation5 + $0xc0] sm:$0xff]   ;;  %v3127_v38 = vld [vmem:[#allocation5 + $0x178] sm:$0xff]  }
  0x3d   :  { %v3117_v26 = vld [vmem:[#allocation5 + $0x8] sm:$0xff]   ;;  %v3121_v30 = vld [vmem:[#allocation5] sm:$0xff]   ;;  %v3128_v39 = vld [vmem:[#allocation5 + $0x1f8] sm:$0xff]  }
  0x3e   :  { %2763 = vmatpush3.bf16.msra.mxu0 %v3101_v10  ;;  %v3118_v27 = vld [vmem:[#allocation5 + $0x88] sm:$0xff]   ;;  %v3122_v31 = vld [vmem:[#allocation5 + $0x80] sm:$0xff]   ;;  %v3129_v40 = vld [vmem:[#allocation5 + $0x138] sm:$0xff]  }
  0x3f   :  { %2785 = vmatpush3.bf16.msra.mxu1 %v3102_v11  ;;  %2764 = vmatprep.subr.bf16.mxu0 %v3103_v12  ;;  %v91_v32 = vld [vmem:[#allocation2] sm:$0xff]  ;;  %v92_v33 = vld [vmem:[#allocation2 + $0x8] sm:$0xff]  ;;  %v3130_v41 = vld [vmem:[#allocation5 + $0x1b8] sm:$0xff]  }
  0x40   :  { %2786 = vmatprep.subr.bf16.mxu1 %v3104_v13  ;;  %v2521_v34 = vcombine.low %v91_v32, %v91_v32  ;;  %v2522_v35 = vcombine.high %v91_v32, %v91_v32  ;;  %v2523_v36 = vcombine.low %v92_v33, %v92_v33  ;;  %v2524_v37 = vcombine.high %v92_v33, %v92_v33  ;;  %v3131_v42 = vld [vmem:[#allocation5 + $0x170] sm:$0xff]   ;;  %v3135_v46 = vld [vmem:[#allocation5 + $0x168] sm:$0xff]   ;;  %v3139_v50 = vld [vmem:[#allocation5 + $0x160] sm:$0xff]  }
  0x41   :  { %v3132_v43 = vld [vmem:[#allocation5 + $0x1f0] sm:$0xff]   ;;  %v3136_v47 = vld [vmem:[#allocation5 + $0x1e8] sm:$0xff]   ;;  %v3140_v51 = vld [vmem:[#allocation5 + $0x1e0] sm:$0xff]  }
  0x42   :  { %2765 = vmatpush3.bf16.msra.mxu0 %v3105_v14  ;;  %1755 = vmatprep.mubr.bf16.mxu0 %v2522_v35  ;;  %v3133_v44 = vld [vmem:[#allocation5 + $0x130] sm:$0xff]   ;;  %v3137_v48 = vld [vmem:[#allocation5 + $0x128] sm:$0xff]   ;;  %v3141_v52 = vld [vmem:[#allocation5 + $0x120] sm:$0xff]  }
  0x43   :  { %2787 = vmatpush3.bf16.msra.mxu1 %v3106_v15  ;;  %2766 = vmatprep.subr.bf16.mxu0 %v3107_v16  ;;  %v3134_v45 = vld [vmem:[#allocation5 + $0x1b0] sm:$0xff]   ;;  %v3138_v49 = vld [vmem:[#allocation5 + $0x1a8] sm:$0xff]   ;;  %v3142_v53 = vld [vmem:[#allocation5 + $0x1a0] sm:$0xff]  }
  0x44   :  { %2788 = vmatprep.subr.bf16.mxu1 %v3108_v17  ;;  %1795 = vmatprep.mubr.bf16.mxu1 %v2524_v37  ;;  %v3143_v54 = vld [vmem:[#allocation5 + $0x158] sm:$0xff]   ;;  %v3147_v58 = vld [vmem:[#allocation5 + $0x150] sm:$0xff]   ;;  %v3151_v62 = vld [vmem:[#allocation5 + $0x148] sm:$0xff]  }
  0x45   :  { %v3144_v55 = vld [vmem:[#allocation5 + $0x1d8] sm:$0xff]   ;;  %v3148_v59 = vld [vmem:[#allocation5 + $0x1d0] sm:$0xff]   ;;  %v3152_v63 = vld [vmem:[#allocation5 + $0x1c8] sm:$0xff]  }
  0x46   :  { %2767 = vmatpush3.bf16.msra.mxu0 %v3109_v18  ;;  %v3145_v56 = vld [vmem:[#allocation5 + $0x118] sm:$0xff]   ;;  %v3149_v60 = vld [vmem:[#allocation5 + $0x110] sm:$0xff]   ;;  %v3153_v0 = vld [vmem:[#allocation5 + $0x108] sm:$0xff]  }
  0x47   :  { %2789 = vmatpush3.bf16.msra.mxu1 %v3110_v19  ;;  %2768 = vmatprep.subr.bf16.mxu0 %v3111_v20  ;;  %v3146_v57 = vld [vmem:[#allocation5 + $0x198] sm:$0xff]   ;;  %v3150_v61 = vld [vmem:[#allocation5 + $0x190] sm:$0xff]   ;;  %v3154_v1 = vld [vmem:[#allocation5 + $0x188] sm:$0xff]  }
  0x48   :  { %2790 = vmatprep.subr.bf16.mxu1 %v3112_v21  ;;  %v3155_v2 = vld [vmem:[#allocation5 + $0x140] sm:$0xff]   ;;  %v93_v6 = vld [vmem:[#allocation2 + $0x10] sm:$0xff]  ;;  %v94_v9 = vld [vmem:[#allocation2 + $0x18] sm:$0xff] }
  0x49   :  { %v3156_v3 = vld [vmem:[#allocation5 + $0x1c0] sm:$0xff]   ;;  %v2525_v7 = vcombine.low %v93_v6, %v93_v6  ;;  %v2526_v8 = vcombine.high %v93_v6, %v93_v6  ;;  %v2527_v10 = vcombine.low %v94_v9, %v94_v9  ;;  %v2528_v11 = vcombine.high %v94_v9, %v94_v9  ;;  %v3163_v12 = vld [vmem:[#allocation5 + $0x278] sm:$0xff]   ;;  %v3167_v16 = vld [vmem:[#allocation5 + $0x270] sm:$0xff]  }
  0x4a   :  { %2769 = vmatpush3.bf16.msra.mxu0 %v3113_v22  ;;  %v3157_v4 = vld [vmem:[#allocation5 + $0x100] sm:$0xff]   ;;  %v3164_v13 = vld [vmem:[#allocation5 + $0x2f8] sm:$0xff]   ;;  %v3168_v17 = vld [vmem:[#allocation5 + $0x2f0] sm:$0xff]  }
  0x4b   :  { %2791 = vmatpush3.bf16.msra.mxu1 %v3114_v23  ;;  %2770 = vmatprep.subr.bf16.mxu0 %v3115_v24  ;;  %v3158_v5 = vld [vmem:[#allocation5 + $0x180] sm:$0xff]   ;;  %v3165_v14 = vld [vmem:[#allocation5 + $0x238] sm:$0xff]   ;;  %v3169_v18 = vld [vmem:[#allocation5 + $0x230] sm:$0xff]  }
  0x4c   :  { %2792 = vmatprep.subr.bf16.mxu1 %v3116_v25  ;;  %v3166_v15 = vld [vmem:[#allocation5 + $0x2b8] sm:$0xff]   ;;  %v3170_v19 = vld [vmem:[#allocation5 + $0x2b0] sm:$0xff]   ;;  %v3171_v20 = vld [vmem:[#allocation5 + $0x268] sm:$0xff]  }
  0x4d   :  { %v3172_v21 = vld [vmem:[#allocation5 + $0x2e8] sm:$0xff]   ;;  %v3175_v24 = vld [vmem:[#allocation5 + $0x260] sm:$0xff]   ;;  %v3183_v32 = vld [vmem:[#allocation5 + $0x250] sm:$0xff]  }
  0x4e   :  { %2771 = vmatpush3.bf16.msra.mxu0 %v3117_v26  ;;  %v3173_v22 = vld [vmem:[#allocation5 + $0x228] sm:$0xff]   ;;  %v3176_v25 = vld [vmem:[#allocation5 + $0x2e0] sm:$0xff]   ;;  %v3184_v33 = vld [vmem:[#allocation5 + $0x2d0] sm:$0xff]  }
  0x4f   :  { %2793 = vmatpush3.bf16.msra.mxu1 %v3118_v27  ;;  %2772 = vmatprep.subr.bf16.mxu0 %v3119_v28  ;;  %v3174_v23 = vld [vmem:[#allocation5 + $0x2a8] sm:$0xff]   ;;  %v3177_v26 = vld [vmem:[#allocation5 + $0x220] sm:$0xff]   ;;  %v3179_v28 = vld [vmem:[#allocation5 + $0x258] sm:$0xff]  }
  0x50   :  { %2794 = vmatprep.subr.bf16.mxu1 %v3120_v29  ;;  %v3178_v27 = vld [vmem:[#allocation5 + $0x2a0] sm:$0xff]   ;;  %v3180_v29 = vld [vmem:[#allocation5 + $0x2d8] sm:$0xff]   ;;  %v3186_v35 = vld [vmem:[#allocation5 + $0x290] sm:$0xff]  }
  0x51   :  { %v3188_v37 = vld [vmem:[#allocation5 + $0x2c8] sm:$0xff]   ;;  %v3219_v6 = vld [vmem:[#allocation5 + $0x350] sm:$0xff]  }
  0x52   :  { %2773 = vmatpush3.bf16.msra.mxu0 %v3121_v30  ;;  %v3181_v30 = vld [vmem:[#allocation5 + $0x218] sm:$0xff]   ;;  %v3222_v9 = vld [vmem:[#allocation5 + $0x390] sm:$0xff]  }
  0x53   :  { %2795 = vmatpush3.bf16.msra.mxu1 %v3122_v31  ;;  %2802 = vmatprep.subr.bf16.mxu0 %v3127_v38  ;;  %v3182_v31 = vld [vmem:[#allocation5 + $0x298] sm:$0xff]   ;;  %v3189_v38 = vld [vmem:[#allocation5 + $0x208] sm:$0xff]  }
  0x54   :  { %2824 = vmatprep.subr.bf16.mxu1 %v3128_v39  ;;  %v3190_v39 = vld [vmem:[#allocation5 + $0x288] sm:$0xff]  }
  0x55   :  { %1756 = vmatmul.mubr.bf16.vlgmr.msra.gmra.mxu0 %v2521_v34  ;;  %v3185_v34 = vld [vmem:[#allocation5 + $0x210] sm:$0xff]  }
  0x56   :  { %1796 = vmatmul.mubr.bf16.vlgmr.msra.gmra.mxu1 %v2523_v36  ;;  %2803 = vmatpush3.bf16.msra.mxu0 %v3129_v40  ;;  %v3187_v36 = vld [vmem:[#allocation5 + $0x248] sm:$0xff]   ;;  %v3191_v40 = vld [vmem:[#allocation5 + $0x240] sm:$0xff]  }
  0x57   :  { %2825 = vmatpush3.bf16.msra.mxu1 %v3130_v41  ;;  %2804 = vmatprep.subr.bf16.mxu0 %v3131_v42  ;;  %v3192_v41 = vld [vmem:[#allocation5 + $0x2c0] sm:$0xff]  }
  0x58   :  { %2826 = vmatprep.subr.bf16.mxu1 %v3132_v43  ;;  %1835 = vmatprep.mubr.bf16.mxu0 %v2526_v8  ;;  %v3193_v42 = vld [vmem:[#allocation5 + $0x200] sm:$0xff]   ;;  %v3221_v8 = vld [vmem:[#allocation5 + $0x310] sm:$0xff]  }
  0x59   :  { %1875 = vmatprep.mubr.bf16.mxu1 %v2528_v11  ;;  %v3194_v43 = vld [vmem:[#allocation5 + $0x280] sm:$0xff]   ;;  %v3224_v11 = vld [vmem:[#allocation5 + $0x3c8] sm:$0xff]  }
  0x5a   :  { %2805 = vmatpush3.bf16.msra.mxu0 %v3133_v44  ;;  %v95_v44 = vld [vmem:[#allocation2 + $0x20] sm:$0xff] }
  0x5b   :  { %2827 = vmatpush3.bf16.msra.mxu1 %v3134_v45  ;;  %2806 = vmatprep.subr.bf16.mxu0 %v3135_v46  ;;  %v96_v45 = vld [vmem:[#allocation2 + $0x28] sm:$0xff]  ;;  %v2529_v46 = vcombine.low %v95_v44, %v95_v44 }
  0x5c   :  { %2828 = vmatprep.subr.bf16.mxu1 %v3136_v47  ;;  %v2530_v47 = vcombine.high %v95_v44, %v95_v44  ;;  %v3255_v44 = vld [vmem:[#allocation5 + $0x450] sm:$0xff]  }
  0x5e   :  { %2807 = vmatpush3.bf16.msra.mxu0 %v3137_v48  ;;  %v2531_v48 = vcombine.low %v96_v45, %v96_v45 }
  0x5f   :  { %2829 = vmatpush3.bf16.msra.mxu1 %v3138_v49  ;;  %2808 = vmatprep.subr.bf16.mxu0 %v3139_v50  ;;  %v2532_v49 = vcombine.high %v96_v45, %v96_v45  ;;  %v3199_v50 = vld [vmem:[#allocation5 + $0x378] sm:$0xff]   ;;  %v3256_v45 = vld [vmem:[#allocation5 + $0x4d0] sm:$0xff]  }
  0x60   :  { %2830 = vmatprep.subr.bf16.mxu1 %v3140_v51  ;;  %v3200_v51 = vld [vmem:[#allocation5 + $0x3f8] sm:$0xff]  }
  0x62   :  { %2809 = vmatpush3.bf16.msra.mxu0 %v3141_v52  ;;  %v3201_v52 = vld [vmem:[#allocation5 + $0x338] sm:$0xff]  }
  0x63   :  { %2831 = vmatpush3.bf16.msra.mxu1 %v3142_v53  ;;  %2810 = vmatprep.subr.bf16.mxu0 %v3143_v54  ;;  %v3202_v53 = vld [vmem:[#allocation5 + $0x3b8] sm:$0xff]   ;;  %v3203_v54 = vld [vmem:[#allocation5 + $0x370] sm:$0xff]  }
  0x64   :  { %2832 = vmatprep.subr.bf16.mxu1 %v3144_v55  ;;  %v3204_v55 = vld [vmem:[#allocation5 + $0x3f0] sm:$0xff]  }
  0x66   :  { %2811 = vmatpush3.bf16.msra.mxu0 %v3145_v56  ;;  %v3205_v56 = vld [vmem:[#allocation5 + $0x330] sm:$0xff]  }
  0x67   :  { %2833 = vmatpush3.bf16.msra.mxu1 %v3146_v57  ;;  %2812 = vmatprep.subr.bf16.mxu0 %v3147_v58  ;;  %v3206_v57 = vld [vmem:[#allocation5 + $0x3b0] sm:$0xff]   ;;  %v3207_v58 = vld [vmem:[#allocation5 + $0x368] sm:$0xff]  }
  0x68   :  { %2834 = vmatprep.subr.bf16.mxu1 %v3148_v59  ;;  %v3208_v59 = vld [vmem:[#allocation5 + $0x3e8] sm:$0xff]  }
  0x6a   :  { %2813 = vmatpush3.bf16.msra.mxu0 %v3149_v60  ;;  %v3209_v60 = vld [vmem:[#allocation5 + $0x328] sm:$0xff]  }
  0x6b   :  { %2835 = vmatpush3.bf16.msra.mxu1 %v3150_v61  ;;  %2814 = vmatprep.subr.bf16.mxu0 %v3151_v62  ;;  %v3210_v61 = vld [vmem:[#allocation5 + $0x3a8] sm:$0xff]   ;;  %v3211_v62 = vld [vmem:[#allocation5 + $0x360] sm:$0xff]  }
  0x6c   :  { %2836 = vmatprep.subr.bf16.mxu1 %v3152_v63  ;;  %v3212_v63 = vld [vmem:[#allocation5 + $0x3e0] sm:$0xff]  }
  0x6e   :  { %2815 = vmatpush3.bf16.msra.mxu0 %v3153_v0  ;;  %v3213_v0 = vld [vmem:[#allocation5 + $0x320] sm:$0xff]  }
  0x6f   :  { %2837 = vmatpush3.bf16.msra.mxu1 %v3154_v1  ;;  %2816 = vmatprep.subr.bf16.mxu0 %v3155_v2  ;;  %v3214_v1 = vld [vmem:[#allocation5 + $0x3a0] sm:$0xff]   ;;  %v3215_v2 = vld [vmem:[#allocation5 + $0x358] sm:$0xff]  }
  0x70   :  { %2838 = vmatprep.subr.bf16.mxu1 %v3156_v3  ;;  %v3216_v3 = vld [vmem:[#allocation5 + $0x3d8] sm:$0xff]  }
  0x72   :  { %2817 = vmatpush3.bf16.msra.mxu0 %v3157_v4  ;;  %v3217_v4 = vld [vmem:[#allocation5 + $0x318] sm:$0xff]  }
  0x73   :  { %2839 = vmatpush3.bf16.msra.mxu1 %v3158_v5  ;;  %2846 = vmatprep.subr.bf16.mxu0 %v3163_v12  ;;  %v3218_v5 = vld [vmem:[#allocation5 + $0x398] sm:$0xff]   ;;  %v3225_v12 = vld [vmem:[#allocation5 + $0x308] sm:$0xff]  }
  0x74   :  { %2868 = vmatprep.subr.bf16.mxu1 %v3164_v13  ;;  %v3226_v13 = vld [vmem:[#allocation5 + $0x388] sm:$0xff]  }
  0x75   :  { %1836 = vmatmul.mubr.bf16.vlgmr.msra.gmra.mxu0 %v2525_v7  ;;  %v3220_v7 = vld [vmem:[#allocation5 + $0x3d0] sm:$0xff]  }
  0x76   :  { %1876 = vmatmul.mubr.bf16.vlgmr.msra.gmra.mxu1 %v2527_v10  ;;  %2847 = vmatpush3.bf16.msra.mxu0 %v3165_v14  ;;  %v3223_v10 = vld [vmem:[#allocation5 + $0x348] sm:$0xff]   ;;  %v3227_v14 = vld [vmem:[#allocation5 + $0x340] sm:$0xff]  }
  0x77   :  { %2869 = vmatpush3.bf16.msra.mxu1 %v3166_v15  ;;  %2848 = vmatprep.subr.bf16.mxu0 %v3167_v16  ;;  %v3228_v15 = vld [vmem:[#allocation5 + $0x3c0] sm:$0xff]  }
  0x78   :  { %2870 = vmatprep.subr.bf16.mxu1 %v3168_v17  ;;  %1915 = vmatprep.mubr.bf16.mxu0 %v2530_v47  ;;  %v3229_v16 = vld [vmem:[#allocation5 + $0x300] sm:$0xff]   ;;  %v3258_v47 = vld [vmem:[#allocation5 + $0x490] sm:$0xff]  }
  0x79   :  { %1955 = vmatprep.mubr.bf16.mxu1 %v2532_v49  ;;  %v3230_v17 = vld [vmem:[#allocation5 + $0x380] sm:$0xff]   ;;  %v3260_v49 = vld [vmem:[#allocation5 + $0x4c8] sm:$0xff]  }
  0x7a   :  { %2849 = vmatpush3.bf16.msra.mxu0 %v3169_v18  ;;  %v97_v18 = vld [vmem:[#allocation2 + $0x30] sm:$0xff] }
  0x7b   :  { %2871 = vmatpush3.bf16.msra.mxu1 %v3170_v19  ;;  %2850 = vmatprep.subr.bf16.mxu0 %v3171_v20  ;;  %v98_v19 = vld [vmem:[#allocation2 + $0x38] sm:$0xff]  ;;  %v2533_v20 = vcombine.low %v97_v18, %v97_v18 }
  0x7c   :  { %2872 = vmatprep.subr.bf16.mxu1 %v3172_v21  ;;  %v2534_v21 = vcombine.high %v97_v18, %v97_v18  ;;  %v3290_v18 = vld [vmem:[#allocation5 + $0x598] sm:$0xff]  }
  0x7e   :  { %2851 = vmatpush3.bf16.msra.mxu0 %v3173_v22  ;;  %v2535_v22 = vcombine.low %v98_v19, %v98_v19 }
  0x7f   :  { %2873 = vmatpush3.bf16.msra.mxu1 %v3174_v23  ;;  %2852 = vmatprep.subr.bf16.mxu0 %v3175_v24  ;;  %v3235_v23 = vld [vmem:[#allocation5 + $0x478] sm:$0xff]   ;;  %v2536_v24 = vcombine.high %v98_v19, %v98_v19  ;;  %v3291_v19 = vld [vmem:[#allocation5 + $0x550] sm:$0xff]  }
  0x80   :  { %2874 = vmatprep.subr.bf16.mxu1 %v3176_v25  ;;  %v3236_v25 = vld [vmem:[#allocation5 + $0x4f8] sm:$0xff]  }
  0x82   :  { %2853 = vmatpush3.bf16.msra.mxu0 %v3177_v26  ;;  %v3237_v26 = vld [vmem:[#allocation5 + $0x438] sm:$0xff]  }
  0x83   :  { %2875 = vmatpush3.bf16.msra.mxu1 %v3178_v27  ;;  %2854 = vmatprep.subr.bf16.mxu0 %v3179_v28  ;;  %v3238_v27 = vld [vmem:[#allocation5 + $0x4b8] sm:$0xff]   ;;  %v3239_v28 = vld [vmem:[#allocation5 + $0x470] sm:$0xff]  }
  0x84   :  { %2876 = vmatprep.subr.bf16.mxu1 %v3180_v29  ;;  %v3240_v29 = vld [vmem:[#allocation5 + $0x4f0] sm:$0xff]  }
  0x86   :  { %2855 = vmatpush3.bf16.msra.mxu0 %v3181_v30  ;;  %v3241_v30 = vld [vmem:[#allocation5 + $0x430] sm:$0xff]  }
  0x87   :  { %2877 = vmatpush3.bf16.msra.mxu1 %v3182_v31  ;;  %2856 = vmatprep.subr.bf16.mxu0 %v3183_v32  ;;  %v3242_v31 = vld [vmem:[#allocation5 + $0x4b0] sm:$0xff]   ;;  %v3243_v32 = vld [vmem:[#allocation5 + $0x468] sm:$0xff]  }
  0x88   :  { %2878 = vmatprep.subr.bf16.mxu1 %v3184_v33  ;;  %v3244_v33 = vld [vmem:[#allocation5 + $0x4e8] sm:$0xff]  }
  0x8a   :  { %2857 = vmatpush3.bf16.msra.mxu0 %v3185_v34  ;;  %v3245_v34 = vld [vmem:[#allocation5 + $0x428] sm:$0xff]  }
  0x8b   :  { %2879 = vmatpush3.bf16.msra.mxu1 %v3186_v35  ;;  %2858 = vmatprep.subr.bf16.mxu0 %v3187_v36  ;;  %v3246_v35 = vld [vmem:[#allocation5 + $0x4a8] sm:$0xff]   ;;  %v3247_v36 = vld [vmem:[#allocation5 + $0x460] sm:$0xff]  }
  0x8c   :  { %2880 = vmatprep.subr.bf16.mxu1 %v3188_v37  ;;  %v3248_v37 = vld [vmem:[#allocation5 + $0x4e0] sm:$0xff]  }
  0x8e   :  { %2859 = vmatpush3.bf16.msra.mxu0 %v3189_v38  ;;  %v3249_v38 = vld [vmem:[#allocation5 + $0x420] sm:$0xff]  }
  0x8f   :  { %2881 = vmatpush3.bf16.msra.mxu1 %v3190_v39  ;;  %2860 = vmatprep.subr.bf16.mxu0 %v3191_v40  ;;  %v3250_v39 = vld [vmem:[#allocation5 + $0x4a0] sm:$0xff]   ;;  %v3251_v40 = vld [vmem:[#allocation5 + $0x458] sm:$0xff]  }
  0x90   :  { %2882 = vmatprep.subr.bf16.mxu1 %v3192_v41  ;;  %v3252_v41 = vld [vmem:[#allocation5 + $0x4d8] sm:$0xff]  }
  0x92   :  { %2861 = vmatpush3.bf16.msra.mxu0 %v3193_v42  ;;  %v3253_v42 = vld [vmem:[#allocation5 + $0x418] sm:$0xff]  }
  0x93   :  { %2883 = vmatpush3.bf16.msra.mxu1 %v3194_v43  ;;  %2890 = vmatprep.subr.bf16.mxu0 %v3199_v50  ;;  %v3254_v43 = vld [vmem:[#allocation5 + $0x498] sm:$0xff]   ;;  %v3261_v50 = vld [vmem:[#allocation5 + $0x408] sm:$0xff]  }
  0x94   :  { %2912 = vmatprep.subr.bf16.mxu1 %v3200_v51  ;;  %v3262_v51 = vld [vmem:[#allocation5 + $0x488] sm:$0xff]  }
  0x95   :  { %1916 = vmatmul.mubr.bf16.vlgmr.msra.gmra.mxu0 %v2529_v46  ;;  %v3257_v46 = vld [vmem:[#allocation5 + $0x410] sm:$0xff]  }
  0x96   :  { %1956 = vmatmul.mubr.bf16.vlgmr.msra.gmra.mxu1 %v2531_v48  ;;  %2891 = vmatpush3.bf16.msra.mxu0 %v3201_v52  ;;  %v3259_v48 = vld [vmem:[#allocation5 + $0x448] sm:$0xff]   ;;  %v3263_v52 = vld [vmem:[#allocation5 + $0x440] sm:$0xff]  }
  0x97   :  { %2913 = vmatpush3.bf16.msra.mxu1 %v3202_v53  ;;  %2892 = vmatprep.subr.bf16.mxu0 %v3203_v54  ;;  %v3264_v53 = vld [vmem:[#allocation5 + $0x4c0] sm:$0xff]  }
  0x98   :  { %2914 = vmatprep.subr.bf16.mxu1 %v3204_v55  ;;  %1995 = vmatprep.mubr.bf16.mxu0 %v2534_v21  ;;  %v3265_v54 = vld [vmem:[#allocation5 + $0x400] sm:$0xff]   ;;  %v3293_v21 = vld [vmem:[#allocation5 + $0x510] sm:$0xff]  }
  0x99   :  { %2035 = vmatprep.mubr.bf16.mxu1 %v2536_v24  ;;  %v3266_v55 = vld [vmem:[#allocation5 + $0x480] sm:$0xff]   ;;  %v3296_v24 = vld [vmem:[#allocation5 + $0x5c8] sm:$0xff]  }
  0x9a   :  { %2893 = vmatpush3.bf16.msra.mxu0 %v3205_v56  ;;  %v99_v56 = vld [vmem:[#allocation2 + $0x40] sm:$0xff] }
  0x9b   :  { %2915 = vmatpush3.bf16.msra.mxu1 %v3206_v57  ;;  %2894 = vmatprep.subr.bf16.mxu0 %v3207_v58  ;;  %v2537_v57 = vcombine.low %v99_v56, %v99_v56  ;;  %v2538_v58 = vcombine.high %v99_v56, %v99_v56 }
  0x9c   :  { %2916 = vmatprep.subr.bf16.mxu1 %v3208_v59  ;;  %v100_v59 = vld [vmem:[#allocation2 + $0x48] sm:$0xff] }
  0x9e   :  { %2895 = vmatpush3.bf16.msra.mxu0 %v3209_v60  ;;  %v2539_v60 = vcombine.low %v100_v59, %v100_v59 }
  0x9f   :  { %2917 = vmatpush3.bf16.msra.mxu1 %v3210_v61  ;;  %2896 = vmatprep.subr.bf16.mxu0 %v3211_v62  ;;  %v2540_v61 = vcombine.high %v100_v59, %v100_v59  ;;  %v3271_v62 = vld [vmem:[#allocation5 + $0x578] sm:$0xff]  }
  0xa0   :  { %2918 = vmatprep.subr.bf16.mxu1 %v3212_v63  ;;  %v3272_v63 = vld [vmem:[#allocation5 + $0x5f8] sm:$0xff]  }
  0xa2   :  { %2897 = vmatpush3.bf16.msra.mxu0 %v3213_v0  ;;  %v3273_v0 = vld [vmem:[#allocation5 + $0x538] sm:$0xff]  }
  0xa3   :  { %2919 = vmatpush3.bf16.msra.mxu1 %v3214_v1  ;;  %2898 = vmatprep.subr.bf16.mxu0 %v3215_v2  ;;  %v3274_v1 = vld [vmem:[#allocation5 + $0x5b8] sm:$0xff]   ;;  %v3275_v2 = vld [vmem:[#allocation5 + $0x570] sm:$0xff]  }
  0xa4   :  { %2920 = vmatprep.subr.bf16.mxu1 %v3216_v3  ;;  %v3276_v3 = vld [vmem:[#allocation5 + $0x5f0] sm:$0xff]  }
  0xa6   :  { %2899 = vmatpush3.bf16.msra.mxu0 %v3217_v4  ;;  %v3277_v4 = vld [vmem:[#allocation5 + $0x530] sm:$0xff]  }
  0xa7   :  { %2921 = vmatpush3.bf16.msra.mxu1 %v3218_v5  ;;  %2900 = vmatprep.subr.bf16.mxu0 %v3219_v6  ;;  %v3278_v5 = vld [vmem:[#allocation5 + $0x5b0] sm:$0xff]   ;;  %v3279_v6 = vld [vmem:[#allocation5 + $0x568] sm:$0xff]  }
  0xa8   :  { %2922 = vmatprep.subr.bf16.mxu1 %v3220_v7  ;;  %v3280_v7 = vld [vmem:[#allocation5 + $0x5e8] sm:$0xff]  }
  0xaa   :  { %2901 = vmatpush3.bf16.msra.mxu0 %v3221_v8  ;;  %v3441_v8 = vmov 0  }
  0xab   :  { %2923 = vmatpush3.bf16.msra.mxu1 %v3222_v9  ;;  %2902 = vmatprep.subr.bf16.mxu0 %v3223_v10  ;;  %v3281_v9 = vld [vmem:[#allocation5 + $0x528] sm:$0xff]  }
  0xac   :  { %2924 = vmatprep.subr.bf16.mxu1 %v3224_v11  ;;  %3090 = vset.pattern.permute.xlu0 %v3441_v8  ;;  %v3282_v10 = vld [vmem:[#allocation5 + $0x5a8] sm:$0xff]   ;;  %v3283_v11 = vld [vmem:[#allocation5 + $0x560] sm:$0xff]  }
  0xae   :  { %2903 = vmatpush3.bf16.msra.mxu0 %v3225_v12  ;;  %v3284_v12 = vld [vmem:[#allocation5 + $0x5e0] sm:$0xff]  }
  0xaf   :  { %2925 = vmatpush3.bf16.msra.mxu1 %v3226_v13  ;;  %2904 = vmatprep.subr.bf16.mxu0 %v3227_v14  ;;  %v3285_v13 = vld [vmem:[#allocation5 + $0x520] sm:$0xff]  }
  0xb0   :  { %2926 = vmatprep.subr.bf16.mxu1 %v3228_v15  ;;  %v3286_v14 = vld [vmem:[#allocation5 + $0x5a0] sm:$0xff]   ;;  %v3287_v15 = vld [vmem:[#allocation5 + $0x558] sm:$0xff]  }
  0xb2   :  { %2905 = vmatpush3.bf16.msra.mxu0 %v3229_v16  ;;  %v3288_v16 = vld [vmem:[#allocation5 + $0x5d8] sm:$0xff]  }
  0xb3   :  { %2927 = vmatpush3.bf16.msra.mxu1 %v3230_v17  ;;  %2934 = vmatprep.subr.bf16.mxu0 %v3235_v23  ;;  %v3289_v17 = vld [vmem:[#allocation5 + $0x518] sm:$0xff]   ;;  %v3295_v23 = vld [vmem:[#allocation5 + $0x548] sm:$0xff]  }
  0xb4   :  { %2956 = vmatprep.subr.bf16.mxu1 %v3236_v25  ;;  %v3297_v25 = vld [vmem:[#allocation5 + $0x508] sm:$0xff]  }
  0xb5   :  { %1996 = vmatmul.mubr.bf16.vlgmr.msra.gmra.mxu0 %v2533_v20  ;;  %v3292_v20 = vld [vmem:[#allocation5 + $0x5d0] sm:$0xff]  }
  0xb6   :  { %2036 = vmatmul.mubr.bf16.vlgmr.msra.gmra.mxu1 %v2535_v22  ;;  %2935 = vmatpush3.bf16.msra.mxu0 %v3237_v26  ;;  %v3294_v22 = vld [vmem:[#allocation5 + $0x590] sm:$0xff]   ;;  %v3298_v26 = vld [vmem:[#allocation5 + $0x588] sm:$0xff]  }
  0xb7   :  { %2957 = vmatpush3.bf16.msra.mxu1 %v3238_v27  ;;  %2936 = vmatprep.subr.bf16.mxu0 %v3239_v28  ;;  %v3299_v27 = vld [vmem:[#allocation5 + $0x540] sm:$0xff]  }
  0xb8   :  { %2958 = vmatprep.subr.bf16.mxu1 %v3240_v29  ;;  %2075 = vmatprep.mubr.bf16.mxu0 %v2538_v58  ;;  %v3300_v28 = vld [vmem:[#allocation5 + $0x5c0] sm:$0xff]  }
  0xb9   :  { %2115 = vmatprep.mubr.bf16.mxu1 %v2540_v61  ;;  %v3301_v29 = vld [vmem:[#allocation5 + $0x500] sm:$0xff]   ;;  %v3307_v61 = vld [vmem:[#allocation7 + $0x38] sm:$0xff]  }
  0xba   :  { %2937 = vmatpush3.bf16.msra.mxu0 %v3241_v30  ;;  %v3302_v30 = vld [vmem:[#allocation5 + $0x580] sm:$0xff]  }
  0xbb   :  { %2959 = vmatpush3.bf16.msra.mxu1 %v3242_v31  ;;  %2938 = vmatprep.subr.bf16.mxu0 %v3243_v32  ;;  %v101_v31 = vld [vmem:[#allocation2 + $0x50] sm:$0xff]  ;;  %v102_v32 = vld [vmem:[#allocation2 + $0x58] sm:$0xff] }
  0xbc   :  { %2960 = vmatprep.subr.bf16.mxu1 %v3244_v33  ;;  %v2541_v33 = vcombine.low %v101_v31, %v101_v31 }
  0xbe   :  { %2939 = vmatpush3.bf16.msra.mxu0 %v3245_v34  ;;  %v2542_v34 = vcombine.high %v101_v31, %v101_v31 }
  0xbf   :  { %2961 = vmatpush3.bf16.msra.mxu1 %v3246_v35  ;;  %2940 = vmatprep.subr.bf16.mxu0 %v3247_v36  ;;  %v2543_v35 = vcombine.low %v102_v32, %v102_v32  ;;  %v2544_v36 = vcombine.high %v102_v32, %v102_v32 }
  0xc0   :  { %2962 = vmatprep.subr.bf16.mxu1 %v3248_v37  ;;  %v90_v37 = vld [vmem:[%s3560_s0] sm:$0xff] }
  0xc1   :  { %2242 = vperm.xlu0 %3090, %v90_v37  }
  0xc2   :  { %2941 = vmatpush3.bf16.msra.mxu0 %v3249_v38 }
  0xc3   :  { %2963 = vmatpush3.bf16.msra.mxu1 %v3250_v39  ;;  %2942 = vmatprep.subr.bf16.mxu0 %v3251_v40 }
  0xc4   :  { %2964 = vmatprep.subr.bf16.mxu1 %v3252_v41 }
  0xc6   :  { %2943 = vmatpush3.bf16.msra.mxu0 %v3253_v42 }
  0xc7   :  { %2965 = vmatpush3.bf16.msra.mxu1 %v3254_v43  ;;  %2944 = vmatprep.subr.bf16.mxu0 %v3255_v44 }
  0xc8   :  { %2966 = vmatprep.subr.bf16.mxu1 %v3256_v45 }
  0xca   :  { %2945 = vmatpush3.bf16.msra.mxu0 %v3257_v46 }
  0xcb   :  { %2967 = vmatpush3.bf16.msra.mxu1 %v3258_v47  ;;  %2946 = vmatprep.subr.bf16.mxu0 %v3259_v48 }
  0xcc   :  { %2968 = vmatprep.subr.bf16.mxu1 %v3260_v49 }
  0xce   :  { %2947 = vmatpush3.bf16.msra.mxu0 %v3261_v50 }
  0xcf   :  { %2969 = vmatpush3.bf16.msra.mxu1 %v3262_v51  ;;  %2948 = vmatprep.subr.bf16.mxu0 %v3263_v52 }
  0xd0   :  { %2970 = vmatprep.subr.bf16.mxu1 %v3264_v53 }
  0xd2   :  { %2949 = vmatpush3.bf16.msra.mxu0 %v3265_v54 }
  0xd3   :  { %2971 = vmatpush3.bf16.msra.mxu1 %v3266_v55  ;;  %2978 = vmatprep.subr.bf16.mxu0 %v3271_v62  ;;  %v3442_v62 = vmov 0.0  }
  0xd4   :  { %3000 = vmatprep.subr.bf16.mxu1 %v3272_v63  ;;  %v3308_v63 = vld [vmem:[#allocation7 + $0x30] sm:$0xff]  }
  0xd5   :  { %2076 = vmatmul.mubr.bf16.vlgmr.msra.gmra.mxu0 %v2537_v57 }
  0xd6   :  { %2116 = vmatmul.mubr.bf16.vlgmr.msra.gmra.mxu1 %v2539_v60  ;;  %2979 = vmatpush3.bf16.msra.mxu0 %v3273_v0  ;;  %v3309_v0 = vld [vmem:[#allocation7 + $0x28] sm:$0xff]  }
  0xd7   :  { %3001 = vmatpush3.bf16.msra.mxu1 %v3274_v1  ;;  %2980 = vmatprep.subr.bf16.mxu0 %v3275_v2 }
  0xd8   :  { %3002 = vmatprep.subr.bf16.mxu1 %v3276_v3  ;;  %2155 = vmatprep.mubr.bf16.mxu0 %v2542_v34  ;;  %v3310_v3 = vld [vmem:[#allocation7 + $0x20] sm:$0xff]  }
  0xd9   :  { %2195 = vmatprep.mubr.bf16.mxu1 %v2544_v36 }
  0xda   :  { %2981 = vmatpush3.bf16.msra.mxu0 %v3277_v4 }
  0xdb   :  { %3003 = vmatpush3.bf16.msra.mxu1 %v3278_v5  ;;  %2982 = vmatprep.subr.bf16.mxu0 %v3279_v6 }
  0xdc   :  { %3004 = vmatprep.subr.bf16.mxu1 %v3280_v7 }
  0xde   :  { %2983 = vmatpush3.bf16.msra.mxu0 %v3281_v9 }
  0xdf   :  { %3005 = vmatpush3.bf16.msra.mxu1 %v3282_v10  ;;  %2984 = vmatprep.subr.bf16.mxu0 %v3283_v11  ;;  %v3311_v11 = vld [vmem:[#allocation7 + $0x18] sm:$0xff]  }
  0xe0   :  { %3006 = vmatprep.subr.bf16.mxu1 %v3284_v12 }
  0xe2   :  { %2985 = vmatpush3.bf16.msra.mxu0 %v3285_v13 }
  0xe3   :  { %3007 = vmatpush3.bf16.msra.mxu1 %v3286_v14  ;;  %2986 = vmatprep.subr.bf16.mxu0 %v3287_v15  ;;  %v3312_v15 = vld [vmem:[#allocation7 + $0x10] sm:$0xff]  }
  0xe4   :  { %3008 = vmatprep.subr.bf16.mxu1 %v3288_v16  ;;  %v3313_v16 = vld [vmem:[#allocation7 + $0x8] sm:$0xff]  }
  0xe6   :  { %2987 = vmatpush3.bf16.msra.mxu0 %v3289_v17  ;;  %v3314_v17 = vld [vmem:[#allocation7] sm:$0xff]  }
  0xe7   :  { %3009 = vmatpush3.bf16.msra.mxu1 %v3290_v18  ;;  %2988 = vmatprep.subr.bf16.mxu0 %v3291_v19 }
  0xe8   :  { %3010 = vmatprep.subr.bf16.mxu1 %v3292_v20 }
  0xea   :  { %2989 = vmatpush3.bf16.msra.mxu0 %v3293_v21 }
  0xeb   :  { %3011 = vmatpush3.bf16.msra.mxu1 %v3294_v22  ;;  %2990 = vmatprep.subr.bf16.mxu0 %v3295_v23 }
  0xec   :  { %3012 = vmatprep.subr.bf16.mxu1 %v3296_v24 }
  0xee   :  { %2991 = vmatpush3.bf16.msra.mxu0 %v3297_v25 }
  0xef   :  { %3013 = vmatpush3.bf16.msra.mxu1 %v3298_v26  ;;  %2992 = vmatprep.subr.bf16.mxu0 %v3299_v27 }
  0xf0   :  { %3014 = vmatprep.subr.bf16.mxu1 %v3300_v28 }
  0xf2   :  { %2993 = vmatpush3.bf16.msra.mxu0 %v3301_v29 }
  0xf3   :  { %3015 = vmatpush3.bf16.msra.mxu1 %v3302_v30  ;;  %3040 = vmatprep.subr.bf16.mxu0 %v3442_v62 }
  0xf4   :  { %3060 = vmatprep.subr.bf16.mxu1 %v3442_v62 }
  0xf5   :  { %2156 = vmatmul.mubr.bf16.vlgmr.msra.gmra.mxu0 %v2541_v33 }
  0xf6   :  { %2196 = vmatmul.mubr.bf16.vlgmr.msra.gmra.mxu1 %v2543_v35  ;;  %3041 = vmatpush3.bf16.msra.mxu0 %v3307_v61 }
  0xf7   :  { %3042 = vmatprep.subr.bf16.mxu0 %v3442_v62  ;;  %3056 = vmatprep.mubr.msk.bf16.mxu0 %vm3443_vm0, %v3442_v62 }
  0xf8   :  { %3076 = vmatprep.mubr.msk.bf16.mxu1 %vm3443_vm0, %v3442_v62 }
  0xfa   :  { %3043 = vmatpush3.bf16.msra.mxu0 %v3308_v63 }
  0xfb   :  { %3044 = vmatprep.subr.bf16.mxu0 %v3442_v62 }
  0xfe   :  { %3045 = vmatpush3.bf16.msra.mxu0 %v3309_v0 }
  0xff   :  { %3046 = vmatprep.subr.bf16.mxu0 %v3442_v62 }
 0x102   :  { %3047 = vmatpush3.bf16.msra.mxu0 %v3310_v3 }
 0x103   :  { %3048 = vmatprep.subr.bf16.mxu0 %v3442_v62 }
 0x106   :  { %3049 = vmatpush3.bf16.msra.mxu0 %v3311_v11  ;;  %v2737_v11 = vld [vmem:[%s3564_s4] ss:$0 sm:$0xff] }
 0x107   :  { %3050 = vmatprep.subr.bf16.mxu0 %v3442_v62 }
 0x10a   :  { %3051 = vmatpush3.bf16.msra.mxu0 %v3312_v15 }
 0x10b   :  { %3052 = vmatprep.subr.bf16.mxu0 %v3442_v62 }
 0x10e   :  { %3053 = vmatpush3.bf16.msra.mxu0 %v3313_v16 }
 0x10f   :  { %3054 = vmatprep.subr.bf16.mxu0 %v3442_v62 }
 0x112   :  { %3055 = vmatpush3.bf16.msra.mxu0 %v3314_v17 }
 0x115   :  { %v2774_v38 = vpop.f32.mrf.mxu0 }
 0x116   :  { %v2796_v39 = vpop.f32.mrf.mxu1 }
 0x117   :  { %v2775_v40 = vpop.f32.mrf.mxu0 }
 0x118   :  { %v2797_v41 = vpop.f32.mrf.mxu1  ;;  %v2776_v42 = vadd.f32 %v2775_v40, %v2774_v38 }
 0x119   :  { %v2798_v43 = vadd.f32 %v2797_v41, %v2796_v39  ;;  %v2777_v44 = vpop.f32.mrf.mxu0 }
 0x11a   :  { %v2799_v45 = vpop.f32.mrf.mxu1 }
 0x11b   :  { %v1798_v46 = vadd.f32 %v2798_v43, %v2776_v42  ;;  %v2778_v47 = vpop.f32.mrf.mxu0 }
 0x11c   :  { %v2800_v48 = vpop.f32.mrf.mxu1 }
 0x135   :  { %v2818_v49 = vpop.f32.mrf.mxu0 }
 0x136   :  { %v2840_v50 = vpop.f32.mrf.mxu1 }
 0x137   :  { %v2819_v51 = vpop.f32.mrf.mxu0 }
 0x138   :  { %v2841_v52 = vpop.f32.mrf.mxu1  ;;  %v2820_v53 = vadd.f32 %v2819_v51, %v2818_v49 }
 0x139   :  { %v2842_v54 = vadd.f32 %v2841_v52, %v2840_v50  ;;  %v2821_v55 = vpop.f32.mrf.mxu0 }
 0x13a   :  { %v2843_v56 = vpop.f32.mrf.mxu1  ;;  %v1838_v57 = vadd.f32 %v2820_v53, %v1798_v46 }
 0x13b   :  { %v2822_v58 = vpop.f32.mrf.mxu0 }
 0x13c   :  { %v2844_v59 = vpop.f32.mrf.mxu1  ;;  %v1878_v60 = vadd.f32 %v2842_v54, %v1838_v57  ;;  %v2243_v15 = vpop.permute.xlu0 %2242 }
 0x155   :  { %v2862_v1 = vpop.f32.mrf.mxu0 }
 0x156   :  { %v2884_v2 = vpop.f32.mrf.mxu1 }
 0x157   :  { %v2863_v4 = vpop.f32.mrf.mxu0 }
 0x158   :  { %v2864_v5 = vadd.f32 %v2863_v4, %v2862_v1  ;;  %v2885_v6 = vpop.f32.mrf.mxu1 }
 0x159   :  { %v2886_v7 = vadd.f32 %v2885_v6, %v2884_v2  ;;  %v2865_v8 = vpop.f32.mrf.mxu0 }
 0x15a   :  { %v1918_v9 = vadd.f32 %v2864_v5, %v1878_v60  ;;  %v2887_v10 = vpop.f32.mrf.mxu1 }
 0x15b   :  { %v2866_v12 = vpop.f32.mrf.mxu0 }
 0x15c   :  { %v1958_v13 = vadd.f32 %v2886_v7, %v1918_v9  ;;  %v2888_v14 = vpop.f32.mrf.mxu1 }
 0x175   :  { %v2906_v18 = vpop.f32.mrf.mxu0 }
 0x176   :  { %v2928_v19 = vpop.f32.mrf.mxu1 }
 0x177   :  { %v2907_v20 = vpop.f32.mrf.mxu0 }
 0x178   :  { %v2929_v21 = vpop.f32.mrf.mxu1  ;;  %v2908_v34 = vadd.f32 %v2907_v20, %v2906_v18  ;;  %v3315_v20 = vld [vmem:[#allocation8 + $0x38] sm:$0xff]  }
 0x179   :  { %v2909_v22 = vpop.f32.mrf.mxu0  ;;  %v2930_v36 = vadd.f32 %v2929_v21, %v2928_v19  ;;  %3061 = vmatpush3.bf16.msra.mxu1 %v3315_v20  ;;  %v3316_v21 = vld [vmem:[#allocation8 + $0x30] sm:$0xff]  }
 0x17a   :  { %v2931_v23 = vpop.f32.mrf.mxu1  ;;  %v1998_v35 = vadd.f32 %v2908_v34, %v1958_v13  ;;  %v2738_v13 = vld [vmem:[%s3565_s5] ss:$0 sm:$0xff]  ;;  %3062 = vmatprep.subr.bf16.mxu1 %v3442_v62  ;;  %v3317_v22 = vld [vmem:[#allocation8 + $0x28] sm:$0xff]  }
 0x17b   :  { %v2910_v24 = vpop.f32.mrf.mxu0  ;;  %v3318_v23 = vld [vmem:[#allocation8 + $0x20] sm:$0xff]  }
 0x17c   :  { %v2932_v25 = vpop.f32.mrf.mxu1  ;;  %v2038_v38 = vadd.f32 %v2930_v36, %v1998_v35  ;;  %v3319_v24 = vld [vmem:[#allocation8 + $0x18] sm:$0xff]  }
 0x17d   :  { %3063 = vmatpush3.bf16.msra.mxu1 %v3316_v21  ;;  %v3320_v25 = vld [vmem:[#allocation8 + $0x10] sm:$0xff]  }
 0x17e   :  { %3064 = vmatprep.subr.bf16.mxu1 %v3442_v62 }
 0x181   :  { %3065 = vmatpush3.bf16.msra.mxu1 %v3317_v22 }
 0x182   :  { %3066 = vmatprep.subr.bf16.mxu1 %v3442_v62 }
 0x185   :  { %3067 = vmatpush3.bf16.msra.mxu1 %v3318_v23 }
 0x186   :  { %3068 = vmatprep.subr.bf16.mxu1 %v3442_v62 }
 0x189   :  { %3069 = vmatpush3.bf16.msra.mxu1 %v3319_v24 }
 0x18a   :  { %3070 = vmatprep.subr.bf16.mxu1 %v3442_v62 }
 0x18d   :  { %3071 = vmatpush3.bf16.msra.mxu1 %v3320_v25 }
 0x18e   :  { %3072 = vmatprep.subr.bf16.mxu1 %v3442_v62 }
 0x195   :  { %v2950_v26 = vpop.f32.mrf.mxu0 }
 0x196   :  { %v2972_v27 = vpop.f32.mrf.mxu1 }
 0x197   :  { %v2951_v28 = vpop.f32.mrf.mxu0 }
 0x198   :  { %v2973_v29 = vpop.f32.mrf.mxu1  ;;  %v2952_v37 = vadd.f32 %v2951_v28, %v2950_v26  ;;  %v3321_v26 = vld [vmem:[#allocation8 + $0x8] sm:$0xff]  }
 0x199   :  { %v2953_v30 = vpop.f32.mrf.mxu0  ;;  %v2974_v40 = vadd.f32 %v2973_v29, %v2972_v27  ;;  %3073 = vmatpush3.bf16.msra.mxu1 %v3321_v26  ;;  %v3322_v27 = vld [vmem:[#allocation8] sm:$0xff]  }
 0x19a   :  { %v2975_v31 = vpop.f32.mrf.mxu1  ;;  %v2078_v39 = vadd.f32 %v2952_v37, %v2038_v38  ;;  %3074 = vmatprep.subr.bf16.mxu1 %v3442_v62 }
 0x19b   :  { %v2954_v32 = vpop.f32.mrf.mxu0 }
 0x19c   :  { %v2976_v33 = vpop.f32.mrf.mxu1  ;;  %v2118_v44 = vadd.f32 %v2974_v40, %v2078_v39 }
 0x19d   :  { %3075 = vmatpush3.bf16.msra.mxu1 %v3322_v27 }
 0x1b5   :  { %v2994_v41 = vpop.f32.mrf.mxu0 }
 0x1b6   :  { %v3016_v42 = vpop.f32.mrf.mxu1 }
 0x1b7   :  { %v2995_v43 = vpop.f32.mrf.mxu0 }
 0x1b8   :  { %v2996_v45 = vadd.f32 %v2995_v43, %v2994_v41  ;;  %v3017_v46 = vpop.f32.mrf.mxu1 }
 0x1b9   :  { %v2997_v47 = vpop.f32.mrf.mxu0  ;;  %v3018_v49 = vadd.f32 %v3017_v46, %v3016_v42 }
 0x1ba   :  { %v2158_v48 = vadd.f32 %v2996_v45, %v2118_v44  ;;  %v3019_v50 = vpop.f32.mrf.mxu1 }
 0x1bb   :  { %v2998_v51 = vpop.f32.mrf.mxu0 }
 0x1bc   :  { %v2198_v52 = vadd.f32 %v3018_v49, %v2158_v48  ;;  %v3020_v53 = vpop.f32.mrf.mxu1  ;;  %v2747_v51 = vld [vmem:[%s3567_s7] ss:$0 sm:$0xff]  ;;  %s3407_s7 = scalar_lea.vmem %s2511_s21, 128 }
 0x1bd   :  { %v2748_v53 = vld [vmem:[%s3568_s8] ss:$0 sm:$0xff]  ;;  %p3408_p6 = scmp.ne.s32.totalorder %s2511_s21, %s3407_s7  ;;  %p3413_p8 = scmp.lt.s32.totalorder %s3407_s7, %s3407_s7 }
 0x1be   :  { %v2203_v54 = vrot.slane %v2198_v52, 4  ;;  %v2209_v55 = vmul.f32 %v2198_v52, %v2198_v52 }
 0x1bf   :  { %p3414_p9 = por %p3413_p8, %p3412_p7 }
 0x1c0   :  { %v2204_v56 = vadd.f32 %v2203_v54, %v2198_v52  ;;  %v2210_v57 = vrot.slane %v2209_v55, 4 }
 0x1c1   :  { %p3415_p10 = pnand %p3414_p9, %p3408_p6 }
 0x1c2   :  { %v2205_v58 = vrot.slane %v2204_v56, 2  ;;  %v2211_v59 = vadd.f32 %v2210_v57, %v2209_v55 }
 0x1c4   :  { %v2206_v60 = vadd.f32 %v2205_v58, %v2204_v56  ;;  %v2212_v61 = vrot.slane %v2211_v59, 2 }
 0x1c6   :  { %v2213_v63 = vadd.f32 %v2212_v61, %v2211_v59  ;;  %v2207_v0 = vrot.slane %v2206_v60, 1  ;;  %v2749_v59 = vld [vmem:[%s3569_s9] ss:$0 sm:$0xff] }
 0x1c8   :  { %v2214_v1 = vrot.slane %v2213_v63, 1  ;;  %v2208_v2 = vadd.f32 %v2207_v0, %v2206_v60 }
 0x1ca   :  { %v2215_v3 = vadd.f32 %v2214_v1, %v2213_v63  ;;  %v2216_v4 = vmul.f32 0.5, %v2208_v2 }
 0x1cc   :  { %v2217_v5 = vmul.f32 0.5, %v2215_v3  ;;  %v2218_v6 = vmul.f32 %v2216_v4, %v2216_v4  ;;  %v2220_v9 = vsub.f32 %v2198_v52, %v2216_v4 }
 0x1ce   :  { %v2219_v7 = vsub.f32 %v2217_v5, %v2218_v6 }
 0x1d0   :  { %v2221_v8 = vadd.f32 1e-05, %v2219_v7 }
 0x1d2   :  { %3323 = vrsqrt.f32 %v2221_v8 }
 0x1df   :  { %v3324_v10 = vpop.eup %3323 }
 0x1e0   :  { %v2223_v12 = vmul.f32 %v3324_v10, %v2220_v9 }
 0x1e2   :  { %v2231_v14 = vmul.f32 %v2737_v11, %v2223_v12 }
 0x1e4   :  { %v2239_v16 = vadd.f32 %v2738_v13, %v2231_v14 }
 0x1e6   :  { %v2245_v17 = vmul.f32 %v2243_v15, %v2239_v16 }
 0x1e8   :  { %v2246_v18 = vmax.f32 %v2245_v17, 0.0 }
 0x1ea   :  { %v2247_v19 = vpack.c.bf16 %v2246_v18, %v2246_v18 }
 0x1ec   :  { %3057 = vmatmul.mubr.bf16.vlgmr.msra.gmra.mxu0 %v2247_v19 }
 0x2ac   :  { %v2346_v28 = vpop.f32.mrf.mxu0 }
 0x2ad   :  { %v2352_v29 = vrot.slane %v2346_v28, 4  ;;  %v2358_v30 = vmul.f32 %v2346_v28, %v2346_v28 }
 0x2ae   :  { %v3058_v31 = vpop.f32.mrf.mxu0 }
 0x2af   :  { %v2353_v32 = vadd.f32 %v2352_v29, %v2346_v28  ;;  %v2359_v33 = vrot.slane %v2358_v30, 4 }
 0x2b0   :  { %v2349_v34 = vpop.f32.mrf.mxu0 }
 0x2b1   :  { %v2354_v35 = vrot.slane %v2353_v32, 2  ;;  %v2360_v36 = vadd.f32 %v2359_v33, %v2358_v30 }
 0x2b2   :  { %v3059_v37 = vpop.f32.mrf.mxu0 }
 0x2b3   :  { %v2355_v38 = vadd.f32 %v2354_v35, %v2353_v32  ;;  %v2361_v39 = vrot.slane %v2360_v36, 2 }
 0x2b5   :  { %v2356_v40 = vrot.slane %v2355_v38, 1  ;;  %v2362_v41 = vadd.f32 %v2361_v39, %v2360_v36 }
 0x2b7   :  { %v2357_v42 = vadd.f32 %v2356_v40, %v2355_v38  ;;  %v2363_v43 = vrot.slane %v2362_v41, 1 }
 0x2b9   :  { %v2364_v44 = vadd.f32 %v2363_v43, %v2362_v41  ;;  %v2365_v45 = vmul.f32 0.5, %v2357_v42 }
 0x2bb   :  { %v2366_v62 = vmul.f32 0.5, %v2364_v44  ;;  %v2367_v46 = vmul.f32 %v2365_v45, %v2365_v45  ;;  %v2369_v49 = vsub.f32 %v2346_v28, %v2365_v45 }
 0x2bd   :  { %v2368_v47 = vsub.f32 %v2366_v62, %v2367_v46 }
 0x2bf   :  { %v2370_v48 = vadd.f32 1e-05, %v2368_v47 }
 0x2c1   :  { %3325 = vrsqrt.f32 %v2370_v48 }
 0x2ce   :  { %v3326_v50 = vpop.eup %3325 }
 0x2cf   :  { %v2372_v52 = vmul.f32 %v3326_v50, %v2369_v49 }
 0x2d1   :  { %v2380_v54 = vmul.f32 %v2747_v51, %v2372_v52 }
 0x2d3   :  { %v2388_v55 = vadd.f32 %v2748_v53, %v2380_v54 }
 0x2d5   :  { %v2389_v56 = vmul.f32 %v2388_v55, %v2243_v15 }
 0x2d7   :  { %v2390_v57 = vmax.f32 %v2389_v56, 0.0 }
 0x2d9   :  { %v2391_v58 = vpack.c.bf16 %v2390_v57, %v2390_v57 }
 0x2db   :  { %3077 = vmatmul.mubr.bf16.vlgmr.msra.gmra.mxu1 %v2391_v58 }
 0x39b   :  { %v2497_v60 = vpop.f32.mrf.mxu1 }
 0x39c   :  { %v2498_v61 = vadd.f32 %v2749_v59, %v2497_v60 }
 0x39d   :  { %v3078_v63 = vpop.f32.mrf.mxu1 }
 0x39e   :  { %2503 = vst [vmem:[#allocation10] sm:$0xff] %v2498_v61 }
 0x39f   :  { %v2500_v0 = vpop.f32.mrf.mxu1 }
 0x3a0   :  { %3418 = shalt.err (!%p3415_p10)
}
 0x3a1   :  { %2513 = dma.vmem_to_hbm [thread:$0]  %s2511_s21, 128, %s3570_s10, [#allocation4]   ;;  %v3079_v1 = vpop.f32.mrf.mxu1 }
 0x3a2   :  { %3433 = dma.done.wait [#allocation4], 128  }
 0x3a3   :  { %3434 = vsyncadd [#allocation4], 4294967168 }
 0x3a4   :  { %2517 = vsyncpa [#allocation3], 1 }
 0x3a5   :  { %2518 = vsyncpa [#allocation6], 1 }
 0x3a6   :  { %2519 = vsyncpa [#allocation9], 1 }
 0x3a7   :  { %2520 = vsyncpa [#allocation4], 1 }

</bundles_post_ra>
